<compile_context>
chip_gen: v7x
topology: tpu7x:2x2x1
jax: 0.10.0
libtpu: 0.0.40
codegen_flags: <defaults>
</compile_context>

<pallas_src>
import math

import jax
import jax.numpy as jnp
from jax import lax
from jax.experimental import pallas as pl
from jax.experimental.pallas import tpu as pltpu


# ---------------------------------------------------------------------------
# Kernels
# ---------------------------------------------------------------------------

def _col_phase(if_ref, tw, w_tile_idx):
    """Phase matrix pos * iF for one W tile: (C//2, TW) f32, W on the lane axis."""
    c_half = if_ref.shape[0]
    pos = (w_tile_idx * tw
           + lax.broadcasted_iota(jnp.int32, (c_half, tw), 1)).astype(jnp.float32)
    return pos * if_ref[...]                                   # (C//2, TW)


def pos_encoding_kernel(if_ref, row_ref, out_ref):
    """Module-semantics tile: out[c,h,w] = row[c,h] + (sin|cos)(w*iF).

    if_ref : (C//2, 1)   inverse frequencies (f32)
    row_ref: (C, H)      learned row embeddings (f32)
    out_ref: (C, H, TW)  output tile, already in the final dtype
    """
    c_half = if_ref.shape[0]
    tw = out_ref.shape[-1]
    phase = _col_phase(if_ref, tw, pl.program_id(0))           # (C//2, TW)
    row = row_ref[...]                                         # (C, H)
    # Write sin / cos halves separately (no sublane-axis concat / relayout).
    out_ref[:c_half] = (row[:c_half, :, None]
                        + jnp.sin(phase)[:, None, :]).astype(out_ref.dtype)
    out_ref[c_half:] = (row[c_half:, :, None]
                        + jnp.cos(phase)[:, None, :]).astype(out_ref.dtype)


def pos_encoding_add_kernel(if_ref, row_ref, img_ref, out_ref):
    """Fused consumer add: out = image + pos_embs for one (batch, W-tile) block.

    img_ref/out_ref: (C, H, TW) — batch dim squeezed by the BlockSpec.
    """
    c_half = if_ref.shape[0]
    tw = out_ref.shape[-1]
    phase = _col_phase(if_ref, tw, pl.program_id(1))           # grid = (N, Wt)
    row = row_ref[...]
    img = img_ref[...].astype(jnp.float32)   # f32 math (v5e lacks bf16 VPU/EUP)
    out_ref[:c_half] = (img[:c_half] + row[:c_half, :, None]
                        + jnp.sin(phase)[:, None, :]).astype(out_ref.dtype)
    out_ref[c_half:] = (img[c_half:] + row[c_half:, :, None]
                        + jnp.cos(phase)[:, None, :]).astype(out_ref.dtype)


# ---------------------------------------------------------------------------
# Tile selection & wrappers
# ---------------------------------------------------------------------------

_VMEM_LIMIT_BYTES = 64 << 20   # well above worst-case working set (~26 MiB),
                               # lifts v5e's 16 MiB default scoped limit.


def _pick_tile_w(width, c, h, itemsize, *, target_bytes=4 << 20, min_steps=4):
    """Lane-aligned, bytes-targeted W tile size.

    Targets ~`target_bytes` per output block (double-buffered => 2x in VMEM).
    When the width allows it *and* the blocks stay >= 1 MiB, caps the tile so
    there are >= `min_steps` grid steps: keeps >=2 steps per TensorCore on v7x
    megacore and keeps the writeback DMA overlapped.  Small configs instead get
    a single large block so the ~0.35 us per-step overhead is paid once.
    """
    if width % 128 != 0:
        # Non-lane-aligned width: single full-extent block if small (always
        # legal), otherwise 256-wide tiles with a masked ragged last block.
        return width if width <= 512 else 256
    per_col_bytes = c * h * itemsize
    tw = max(128, min(width, (target_bytes // per_col_bytes) // 128 * 128))
    cap = (width // min_steps) // 128 * 128
    if cap >= 128 and cap * per_col_bytes >= (1 << 20):
        tw = min(tw, cap)
    return tw


def _prep_params(row_embs, inv_freq):
    _, c, h, _ = row_embs.shape
    assert c % 2 == 0, "hidden_size must be even"
    row2d = row_embs.reshape(c, h).astype(jnp.float32)
    if2d = inv_freq.reshape(c // 2, 1).astype(jnp.float32)
    return c, h, row2d, if2d


def position_encoding(image, row_embs, inv_freq, *, tile_w=None):
    """Pallas equivalent of PositionEncoding.forward (module semantics).

    image   : (N, C_img, H_img, W) — only shape[-1] and dtype are used.
    row_embs: (1, hidden_size, height, 1)
    inv_freq: (hidden_size // 2,)
    returns : (1, hidden_size, height, W) in image.dtype
    """
    width = image.shape[-1]
    dtype = image.dtype
    c, h, row2d, if2d = _prep_params(row_embs, inv_freq)
    c_half = c // 2

    tw = tile_w if tile_w is not None else _pick_tile_w(
        width, c, h, jnp.dtype(dtype).itemsize)
    grid_w = pl.cdiv(width, tw)

    out = pl.pallas_call(
        pos_encoding_kernel,
        out_shape=jax.ShapeDtypeStruct((c, h, width), dtype),
        grid=(grid_w,),
        in_specs=[
            pl.BlockSpec((c_half, 1), lambda i: (0, 0)),
            pl.BlockSpec((c, h), lambda i: (0, 0)),
        ],
        out_specs=pl.BlockSpec((c, h, tw), lambda i: (0, 0, i)),
        compiler_params=pltpu.CompilerParams(
            dimension_semantics=("parallel",),
            vmem_limit_bytes=_VMEM_LIMIT_BYTES),
    )(if2d, row2d)

    # Free reshape (metadata only) — the kernel already wrote the final dtype.
    return out.reshape(1, c, h, width)


def position_encoding_add(image, row_embs, inv_freq, *, tile_w=None):
    """Fused `image + PositionEncoding.forward(image)` (the downstream consumer).

    Avoids materializing pos_embs in HBM: reads the image tile, adds the
    positional encoding on the fly, writes the sum.  Halves the HBM traffic of
    the (pos-encoding + add) pair.

    image   : (N, hidden_size, height, W)
    returns : (N, hidden_size, height, W) in image.dtype
    """
    n, c_img, h_img, width = image.shape
    dtype = image.dtype
    c, h, row2d, if2d = _prep_params(row_embs, inv_freq)
    assert (c_img, h_img) == (c, h), "image must match (hidden_size, height)"
    c_half = c // 2

    tw = tile_w if tile_w is not None else _pick_tile_w(
        width, c, h, jnp.dtype(dtype).itemsize)
    grid_w = pl.cdiv(width, tw)

    return pl.pallas_call(
        pos_encoding_add_kernel,
        out_shape=jax.ShapeDtypeStruct((n, c, h, width), dtype),
        grid=(n, grid_w),
        in_specs=[
            pl.BlockSpec((c_half, 1), lambda b, i: (0, 0)),
            pl.BlockSpec((c, h), lambda b, i: (0, 0)),
            pl.BlockSpec((None, c, h, tw), lambda b, i: (b, 0, 0, i)),
        ],
        out_specs=pl.BlockSpec((None, c, h, tw), lambda b, i: (b, 0, 0, i)),
        compiler_params=pltpu.CompilerParams(
            dimension_semantics=("parallel", "parallel"),
            vmem_limit_bytes=_VMEM_LIMIT_BYTES),
    )(if2d, row2d, image)


# ---------------------------------------------------------------------------
# Pure-JAX reference (mirrors the PyTorch forward line-by-line)
# ---------------------------------------------------------------------------

def position_encoding_ref(image, row_embs, inv_freq):
    width = image.shape[-1]
    pos = jnp.arange(width, dtype=image.dtype)
    pos = pos[:, None] * inv_freq.astype(image.dtype)     # (W, C//2)
    sin, cos = jnp.sin(pos), jnp.cos(pos)
    col_embs = jnp.concatenate([sin, cos], axis=1)         # (W, C)
    col_embs = col_embs.T[None, :, None, :]                # (1, C, 1, W)
    return row_embs.astype(image.dtype) + col_embs         # (1, C, H, W)


# ---------------------------------------------------------------------------
# Self-test
# ---------------------------------------------------------------------------

if __name__ == "__main__":
    hidden_size, height, batch = 32, 8, 2

    key = jax.random.PRNGKey(0)
    k_img, k_row = jax.random.split(key)

    # Buffer exactly as the PyTorch module builds it (no exp(), per the spec).
    inv_freq = jnp.arange(0, hidden_size, 2, dtype=jnp.float32) * (
        -math.log(10000.0) / hidden_size
    )
    # Module __init__ uses zeros for row_embs; use small deterministic values
    # instead so the broadcast-add path is actually exercised.
    row_embs = 0.02 * jax.random.normal(k_row, (1, hidden_size, height, 1), jnp.float32)

    # 1) Module semantics, narrow width (W=16): single full-extent block.
    image_s = jax.random.normal(k_img, (batch, hidden_size, height, 16), jnp.float32)
    out_s = jax.block_until_ready(position_encoding(image_s, row_embs, inv_freq))
    ref_s = position_encoding_ref(image_s, row_embs, inv_freq)
    assert out_s.shape == (1, hidden_size, height, 16) and out_s.dtype == jnp.float32
    assert jnp.allclose(out_s, ref_s, atol=1e-5, rtol=1e-5), "mismatch (W=16)"

    # 2) Module semantics, lane-dense W=512; also force a multi-tile grid
    #    (TW=128 -> 4 W tiles).  Looser tolerance: |phase| ~4e3 and Mosaic vs
    #    XLA sin/cos argument reduction can differ by ~1e-3 there.
    image_w = jax.random.normal(k_img, (batch, hidden_size, height, 512), jnp.float32)
    ref_w = position_encoding_ref(image_w, row_embs, inv_freq)
    out_w = jax.block_until_ready(position_encoding(image_w, row_embs, inv_freq))
    assert out_w.shape == (1, hidden_size, height, 512)
    assert jnp.allclose(out_w, ref_w, atol=1e-3, rtol=1e-3), "mismatch (W=512)"
    out_wt = jax.block_until_ready(
        position_encoding(image_w, row_embs, inv_freq, tile_w=128))
    assert jnp.allclose(out_wt, ref_w, atol=1e-3, rtol=1e-3), "mismatch (W=512, TW=128)"

    # 3) bf16 image: kernel computes in f32 and stores bf16 directly.
    image_b = image_w[..., :256].astype(jnp.bfloat16)
    out_b = jax.block_until_ready(position_encoding(image_b, row_embs, inv_freq))
    assert out_b.shape == (1, hidden_size, height, 256) and out_b.dtype == jnp.bfloat16
    ref_b = position_encoding_ref(image_w[..., :256], row_embs, inv_freq)
    assert jnp.allclose(out_b.astype(jnp.float32), ref_b, atol=2e-2, rtol=2e-2), (
        "mismatch (bf16)")

    # 4) Fused consumer add: out = image + pos_embs (pos_embs never hits HBM).
    ref_f = image_w + ref_w
    out_f = jax.block_until_ready(position_encoding_add(image_w, row_embs, inv_freq))
    assert out_f.shape == image_w.shape and out_f.dtype == jnp.float32
    assert jnp.allclose(out_f, ref_f, atol=1e-3, rtol=1e-3), "mismatch (fused)"

    # 5) Fused with an explicit multi-tile grid (2 batches x 4 W tiles).
    out_f2 = jax.block_until_ready(
        position_encoding_add(image_w, row_embs, inv_freq, tile_w=128))
    assert jnp.allclose(out_f2, ref_f, atol=1e-3, rtol=1e-3), "mismatch (fused, TW=128)"

    print("KERNEL_OK")
</pallas_src>

<mosaic_0001>
module attributes {stable_mosaic.version = 11 : i64} {
  func.func @pos_encoding_kernel(%arg0: i32, %arg1: memref<16x1xf32, #tpu.memory_space<vmem>>, %arg2: memref<32x8xf32, #tpu.memory_space<vmem>>, %arg3: memref<32x8x16xf32, #tpu.memory_space<vmem>>) attributes {dimension_semantics = [#tpu.dimension_semantics<parallel>], iteration_bounds = array<i64: 1>, scalar_prefetch = 0 : i64, scratch_operands = 0 : i64, tpu.core_type = #tpu.core_type<tc>, window_params = [{pipeline_mode = #tpu.pipeline_mode<synchronous>, transform_indices = @transform_0, window_bounds = array<i64: 16, 1>}, {pipeline_mode = #tpu.pipeline_mode<synchronous>, transform_indices = @transform_1, window_bounds = array<i64: 32, 8>}, {transform_indices = @transform_2, window_bounds = array<i64: 32, 8, 16>}]} {
    %c16_i32 = arith.constant 16 : i32
    %0 = arith.muli %arg0, %c16_i32 : i32
    %1 = tpu.iota {dimensions = array<i32: 1>} : vector<16x16xi32>
    %2 = vector.broadcast %0 : i32 to vector<16x16xi32>
    %3 = arith.addi %2, %1 : vector<16x16xi32>
    %4 = arith.sitofp %3 : vector<16x16xi32> to vector<16x16xf32>
    %c0 = arith.constant 0 : index
    %c0_0 = arith.constant 0 : index
    %5 = vector.load %arg1[%c0, %c0_0] : memref<16x1xf32, #tpu.memory_space<vmem>>, vector<16x1xf32>
    %6 = vector.broadcast %5 : vector<16x1xf32> to vector<16x16xf32>
    %7 = arith.mulf %4, %6 : vector<16x16xf32>
    %c0_1 = arith.constant 0 : index
    %c0_2 = arith.constant 0 : index
    %8 = vector.load %arg2[%c0_1, %c0_2] : memref<32x8xf32, #tpu.memory_space<vmem>>, vector<32x8xf32>
    %9 = vector.extract_strided_slice %8 {offsets = [0, 0], sizes = [16, 8], strides = [1, 1]} : vector<32x8xf32> to vector<16x8xf32>
    %10 = vector.shape_cast %9 : vector<16x8xf32> to vector<16x8x1xf32>
    %11 = math.sin %7 : vector<16x16xf32>
    %12 = vector.shape_cast %11 : vector<16x16xf32> to vector<16x1x16xf32>
    %13 = vector.broadcast %10 : vector<16x8x1xf32> to vector<16x8x16xf32>
    %14 = vector.broadcast %12 : vector<16x1x16xf32> to vector<16x8x16xf32>
    %15 = arith.addf %13, %14 : vector<16x8x16xf32>
    %c0_3 = arith.constant 0 : index
    %c0_4 = arith.constant 0 : index
    %c0_5 = arith.constant 0 : index
    %16 = vector.load %arg3[%c0_3, %c0_4, %c0_5] : memref<32x8x16xf32, #tpu.memory_space<vmem>>, vector<16x8x16xf32>
    tpu.vector_store %arg3[%c0_3, %c0_4, %c0_5], %15 {strides = array<i32>} : memref<32x8x16xf32, #tpu.memory_space<vmem>>, vector<16x8x16xf32>,
    %17 = vector.extract_strided_slice %8 {offsets = [16, 0], sizes = [16, 8], strides = [1, 1]} : vector<32x8xf32> to vector<16x8xf32>
    %18 = vector.shape_cast %17 : vector<16x8xf32> to vector<16x8x1xf32>
    %19 = math.cos %7 : vector<16x16xf32>
    %20 = vector.shape_cast %19 : vector<16x16xf32> to vector<16x1x16xf32>
    %21 = vector.broadcast %18 : vector<16x8x1xf32> to vector<16x8x16xf32>
    %22 = vector.broadcast %20 : vector<16x1x16xf32> to vector<16x8x16xf32>
    %23 = arith.addf %21, %22 : vector<16x8x16xf32>
    %c16 = arith.constant 16 : index
    %c0_6 = arith.constant 0 : index
    %c0_7 = arith.constant 0 : index
    %24 = vector.load %arg3[%c16, %c0_6, %c0_7] : memref<32x8x16xf32, #tpu.memory_space<vmem>>, vector<16x8x16xf32>
    tpu.vector_store %arg3[%c16, %c0_6, %c0_7], %23 {strides = array<i32>} : memref<32x8x16xf32, #tpu.memory_space<vmem>>, vector<16x8x16xf32>,
    return
  }
  func.func @transform_0(%arg0: i32) -> (i32, i32) {
    %c0_i32 = arith.constant 0 : i32
    %c0_i32_0 = arith.constant 0 : i32
    %c0_i32_1 = arith.constant 0 : i32
    return %c0_i32, %c0_i32_0 : i32, i32
  }
  func.func @transform_1(%arg0: i32) -> (i32, i32) {
    %c0_i32 = arith.constant 0 : i32
    %c0_i32_0 = arith.constant 0 : i32
    %c0_i32_1 = arith.constant 0 : i32
    return %c0_i32, %c0_i32_0 : i32, i32
  }
  func.func @transform_2(%arg0: i32) -> (i32, i32, i32) {
    %c0_i32 = arith.constant 0 : i32
    %c0_i32_0 = arith.constant 0 : i32
    %c0_i32_1 = arith.constant 0 : i32
    return %c0_i32, %c0_i32_0, %arg0 : i32, i32, i32
  }
}

</mosaic_0001>

<bundles_post_ra>
// kernel: tpu_custom_call.1
= control target key start
LH: loop header
LB: loop body
LE: loop exit
PB: predicated region body
PF: predicated region fallthrough
CT: control target
= control target key end

     0   :  { %7 = vsyncpa [#allocation3], 0  ;;  %s1646_s0 = inlined_call_operand.hbm [shape: f32[16,1], index: 0, kind: input, shape index: {}]   ;;  %s1647_s1 = inlined_call_operand.hbm [shape: f32[32,8], index: 1, kind: input, shape index: {}]   ;;  %s1648_s2 = inlined_call_operand.hbm [shape: f32[32,8,16], index: 2, kind: output, shape index: {}]  }
   0x1   :  { %8 = vsyncpa [#allocation6], 0 }
   0x2   :  { %9 = vsyncpa [#allocation4], 0  ;;  %s1264_s9 = smov [#allocation2]   ;;  %s1192_s13 = scalar_lea.hbm %s1646_s0, 256 }
   0x3   :  { %s15_s10 = sshll.u32 %s1264_s9, 4  ;;  %p1193_p0 = scmp.ne.s32.totalorder %s1646_s0, %s1192_s13  ;;  %s16_s10 = int_to_ptr.vmem [resolvable:$true] %s15_s10 }
   0x4   :  { %p1196_p1 = scmp.lt.u32.totalorder %s1192_s13, %s1646_s0 }
   0x6   :  { %p1198_p2 = pnand %p1196_p1, %p1193_p0 }
   0x8   :  { %1201 = shalt.err (!%p1198_p2)
}
   0x9   :  { %s1202_s18 = scalar_lea.vmem %s16_s10, 256  ;;  %p1207_p4 = scmp.lt.s32.totalorder %s16_s10, %s16_s10 }
   0xa   :  { %p1203_p3 = scmp.ne.s32.totalorder %s16_s10, %s1202_s18  ;;  %p1208_p5 = scmp.lt.s32.totalorder %s1202_s18, %s1202_s18 }
   0xc   :  { %p1209_p6 = por %p1208_p5, %p1207_p4 }
   0xe   :  { %p1210_p7 = pnand %p1209_p6, %p1203_p3 }
  0x10   :  { %1213 = shalt.err (!%p1210_p7)
}
  0x11   :  { %s1265_s19 = smov 128   ;;  %s1266_s20 = smov 8  }
  0x12   :  { %21 = dma.hbm_to_vmem [thread:$0]  %s1646_s0, 256, %s16_s10, [#allocation3], %s1265_s19, %s1265_s19, %s1266_s20  }
  0x13   :  { %s1267_s23 = smov [#allocation5]   ;;  %s1214_s27 = scalar_lea.hbm %s1647_s1, 512 }
  0x14   :  { %s27_s24 = sshll.u32 %s1267_s23, 4  ;;  %p1215_p8 = scmp.ne.s32.totalorder %s1647_s1, %s1214_s27  ;;  %s28_s24 = int_to_ptr.vmem [resolvable:$true] %s27_s24 }
  0x15   :  { %p1218_p9 = scmp.lt.u32.totalorder %s1214_s27, %s1647_s1 }
  0x17   :  { %p1220_p10 = pnand %p1218_p9, %p1215_p8 }
  0x19   :  { %1223 = shalt.err (!%p1220_p10)
}
  0x1a   :  { %s1224_s4 = scalar_lea.vmem %s28_s24, 512  ;;  %p1229_p12 = scmp.lt.s32.totalorder %s28_s24, %s28_s24 }
  0x1b   :  { %p1225_p11 = scmp.ne.s32.totalorder %s28_s24, %s1224_s4  ;;  %p1230_p13 = scmp.lt.s32.totalorder %s1224_s4, %s1224_s4 }
  0x1d   :  { %p1231_p0 = por %p1230_p13, %p1229_p12 }
  0x1f   :  { %p1232_p1 = pnand %p1231_p0, %p1225_p11 }
  0x21   :  { %1235 = shalt.err (!%p1232_p1)
}
  0x22   :  { %33 = dma.hbm_to_vmem [thread:$0]  %s1647_s1, 512, %s28_s24, [#allocation6], %s1265_s19, %s1265_s19, %s1266_s20  }
  0x23   :  { %1258 = dma.done.wait [#allocation3], 256  }
  0x24   :  { %1259 = vsyncadd [#allocation3], 4294967040 }
  0x25   :  { %1260 = dma.done.wait [#allocation6], 512  }
  0x26   :  { %1261 = vsyncadd [#allocation6], 4294966784  ;;  %v41_v0 = vlaneseq  ;;  %v1268_v1 = vmov 0   ;;  %v46_v5 = vld [vmem:[#allocation2] sm:$0xff]  ;;  %v60_v6 = vld [vmem:[#allocation5] sm:$0xff]  ;;  %s1276_s1 = smov [#allocation7]  }
  0x27   :  { %1183 = vset.pattern.permute.xlu0 %v1268_v1  ;;  %v47_v9 = vld [vmem:[#allocation2 + $0x8] sm:$0xff]  ;;  %v61_v21 = vld [vmem:[#allocation5 + $0x8] sm:$0xff]  ;;  %v62_v30 = vld [vmem:[#allocation5 + $0x10] sm:$0xff]  ;;  %s1133_s6 = sshll.u32 %s1276_s1, 4  ;;  %s1134_s6 = int_to_ptr.vmem [resolvable:$true] %s1133_s6 }
  0x28   :  { %v1323_v2 = vshrl.u32 %v41_v0, 7  ;;  %50 = vperm.xlu0 %1183, %v46_v5   ;;  %v63_v39 = vld [vmem:[#allocation5 + $0x18] sm:$0xff]  ;;  %v42_v49 = vand.u32 127, %v41_v0  ;;  %s1236_s7 = scalar_lea.vmem %s1134_s6, 4096  ;;  %p1241_p3 = scmp.lt.s32.totalorder %s1134_s6, %s1134_s6 }
  0x29   :  { %p1237_p2 = scmp.ne.s32.totalorder %s1134_s6, %s1236_s7  ;;  %p1242_p4 = scmp.lt.s32.totalorder %s1236_s7, %s1236_s7 }
  0x2a   :  { %v1326_v3 = vsub.s32 0, %v1323_v2  ;;  %v1329_v4 = vsub.s32 1, %v1323_v2  ;;  %v1333_v8 = vsub.s32 2, %v1323_v2  ;;  %v87_v11 = vsub.s32 3, %v1323_v2 }
  0x2b   :  { %v94_v13 = vsub.s32 4, %v1323_v2  ;;  %v101_v15 = vsub.s32 5, %v1323_v2  ;;  %v108_v17 = vsub.s32 6, %v1323_v2  ;;  %v115_v19 = vsub.s32 7, %v1323_v2  ;;  %p1243_p5 = por %p1242_p4, %p1241_p3 }
  0x2c   :  { %v67_v7 = vrot.slane %v60_v6, %v1326_v3  ;;  %v74_v10 = vrot.slane %v60_v6, %v1329_v4  ;;  %55 = vperm.xlu0 %1183, %v47_v9   ;;  %v81_v12 = vrot.slane %v60_v6, %v1333_v8  ;;  %v88_v14 = vrot.slane %v60_v6, %v87_v11 }
  0x2d   :  { %v95_v16 = vrot.slane %v60_v6, %v94_v13  ;;  %v102_v18 = vrot.slane %v60_v6, %v101_v15  ;;  %v109_v20 = vrot.slane %v60_v6, %v108_v17  ;;  %v116_v22 = vrot.slane %v60_v6, %v115_v19  ;;  %p1244_p6 = pnand %p1243_p5, %p1237_p2 }
  0x2e   :  { %69 = vbcast.lane.b32.xlu1 %v67_v7, 256  ;;  %v123_v23 = vrot.slane %v61_v21, %v1326_v3  ;;  %v130_v24 = vrot.slane %v61_v21, %v1329_v4  ;;  %v137_v25 = vrot.slane %v61_v21, %v1333_v8  ;;  %v144_v26 = vrot.slane %v61_v21, %v87_v11 }
  0x2f   :  { %v151_v27 = vrot.slane %v61_v21, %v94_v13  ;;  %v158_v28 = vrot.slane %v61_v21, %v101_v15  ;;  %v165_v29 = vrot.slane %v61_v21, %v108_v17  ;;  %v172_v31 = vrot.slane %v61_v21, %v115_v19 }
  0x30   :  { %83 = vbcast.lane.b32.xlu0 %v81_v12, 256  ;;  %v600_v32 = vrot.slane %v62_v30, %v1326_v3  ;;  %v607_v33 = vrot.slane %v62_v30, %v1329_v4  ;;  %v614_v34 = vrot.slane %v62_v30, %v1333_v8  ;;  %v621_v35 = vrot.slane %v62_v30, %v87_v11 }
  0x31   :  { %v628_v36 = vrot.slane %v62_v30, %v94_v13  ;;  %v635_v37 = vrot.slane %v62_v30, %v101_v15  ;;  %v642_v38 = vrot.slane %v62_v30, %v108_v17  ;;  %v649_v40 = vrot.slane %v62_v30, %v115_v19 }
  0x32   :  { %76 = vbcast.lane.b32.xlu1 %v74_v10, 256  ;;  %v656_v41 = vrot.slane %v63_v39, %v1326_v3  ;;  %v663_v42 = vrot.slane %v63_v39, %v1329_v4  ;;  %v670_v43 = vrot.slane %v63_v39, %v1333_v8  ;;  %v677_v44 = vrot.slane %v63_v39, %v87_v11 }
  0x33   :  { %v684_v45 = vrot.slane %v63_v39, %v94_v13  ;;  %v691_v46 = vrot.slane %v63_v39, %v101_v15  ;;  %v698_v47 = vrot.slane %v63_v39, %v108_v17  ;;  %v705_v48 = vrot.slane %v63_v39, %v115_v19 }
  0x34   :  { %97 = vbcast.lane.b32.xlu0 %v95_v16, 256  ;;  %v45_v50 = vcvt.s32.f32 %v42_v49  ;;  %v1269_v9 = vmov 683565275   ;;  %v1270_v13 = vmov 2475754826  }
  0x35   :  { %v1271_v15 = vmov 2131351028   ;;  %v1272_v17 = vmov 2102212464   ;;  %v1273_v19 = vmov 920167782  }
  0x36   :  { %90 = vbcast.lane.b32.xlu1 %v88_v14, 256 }
  0x38   :  { %111 = vbcast.lane.b32.xlu0 %v109_v20, 256 }
  0x3a   :  { %104 = vbcast.lane.b32.xlu1 %v102_v18, 256 }
  0x3c   :  { %125 = vbcast.lane.b32.xlu0 %v123_v23, 256 }
  0x3e   :  { %118 = vbcast.lane.b32.xlu1 %v116_v22, 256 }
  0x40   :  { %139 = vbcast.lane.b32.xlu0 %v137_v25, 256 }
  0x42   :  { %132 = vbcast.lane.b32.xlu1 %v130_v24, 256 }
  0x44   :  { %153 = vbcast.lane.b32.xlu0 %v151_v27, 256 }
  0x46   :  { %146 = vbcast.lane.b32.xlu1 %v144_v26, 256  ;;  %v1274_v26 = vmov 1326507024  }
  0x48   :  { %167 = vbcast.lane.b32.xlu0 %v165_v29, 256 }
  0x4a   :  { %160 = vbcast.lane.b32.xlu1 %v158_v28, 256 }
  0x4c   :  { %602 = vbcast.lane.b32.xlu0 %v600_v32, 256 }
  0x4e   :  { %174 = vbcast.lane.b32.xlu1 %v172_v31, 256 }
  0x50   :  { %616 = vbcast.lane.b32.xlu0 %v614_v34, 256 }
  0x52   :  { %609 = vbcast.lane.b32.xlu1 %v607_v33, 256 }
  0x54   :  { %630 = vbcast.lane.b32.xlu0 %v628_v36, 256 }
  0x56   :  { %623 = vbcast.lane.b32.xlu1 %v621_v35, 256 }
  0x58   :  { %644 = vbcast.lane.b32.xlu0 %v642_v38, 256 }
  0x5a   :  { %637 = vbcast.lane.b32.xlu1 %v635_v37, 256 }
  0x5c   :  { %658 = vbcast.lane.b32.xlu0 %v656_v41, 256 }
  0x5e   :  { %651 = vbcast.lane.b32.xlu1 %v649_v40, 256 }
  0x60   :  { %672 = vbcast.lane.b32.xlu0 %v670_v43, 256 }
  0x62   :  { %665 = vbcast.lane.b32.xlu1 %v663_v42, 256 }
  0x64   :  { %686 = vbcast.lane.b32.xlu0 %v684_v45, 256 }
  0x66   :  { %679 = vbcast.lane.b32.xlu1 %v677_v44, 256 }
  0x68   :  { %700 = vbcast.lane.b32.xlu0 %v698_v47, 256 }
  0x6a   :  { %693 = vbcast.lane.b32.xlu1 %v691_v46, 256 }
  0x6e   :  { %707 = vbcast.lane.b32.xlu1 %v705_v48, 256 }
  0xa7   :  { %v51_v51 = vpop.permute.xlu0 %50 }
  0xa8   :  { %v1352_v52 = vmul.f32 %v51_v51, %v45_v50 }
  0xaa   :  { %v176_v53 = vand.u32 2147483647, %v1352_v52  ;;  %v179_v54 = vand.u32 2139095040, %v1352_v52  ;;  %vm178_vm14 = vcmp.lt.s32.totalorder %v1352_v52, 0 }
  0xab   :  { %v56_v55 = vpop.permute.xlu0 %55 }
  0xac   :  { %v180_v56 = vshrl.u32 %v179_v54, 23  ;;  %v1356_v57 = vmul.f32 %v56_v55, %v45_v50  ;;  %v183_v58 = vand.u32 8388607, %v176_v53  ;;  %v1383_v54 = vpop.permute.xlu1 %69  ;;  %vm177_vm15 = vcmp.le.f32.partialorder %v176_v53, 0.7853982 }
  0xae   :  { %v1146_v59 = vadd.s32 4294967169, %v180_v56  ;;  %v283_v60 = vand.u32 2139095040, %v1356_v57  ;;  %v184_v62 = vor.u32 8388608, %v183_v58  ;;  %v280_v0 = vand.u32 2147483647, %v1356_v57 }
  0xb0   :  { %v186_v61 = vadd.s32 1, %v1146_v59  ;;  %v284_v63 = vshrl.u32 %v283_v60, 23  ;;  %v1362_v7 = vshll.u32 %v184_v62, 8  ;;  %v287_v11 = vand.u32 8388607, %v280_v0 }
  0xb2   :  { %vm187_vm0 = vcmp.gt.s32.totalorder %v186_v61, 0  ;;  %v1150_v4 = vadd.s32 4294967169, %v284_v63  ;;  %v288_v41 = vor.u32 8388608, %v287_v11 }
  0xb3   :  { %v188_v1 = vsel %vm187_vm0, %v186_v61, 0  ;;  %vm282_vm0 = vcmp.lt.s32.totalorder %v1356_v57, 0 }
  0xb4   :  { %v189_v5 = vshrl.u32 %v188_v1, 5  ;;  %v190_v6 = vand.u32 31, %v188_v1  ;;  %v290_v12 = vadd.s32 1, %v1150_v4  ;;  %v328_v58 = vshll.u32 %v288_v41, 8 }
  0xb6   :  { %v191_v8 = vsub.s32 32, %v190_v6  ;;  %v193_v10 = vshll.u32 %v1269_v9, %v190_v6  ;;  %v196_v14 = vshll.u32 %v1270_v13, %v190_v6  ;;  %v199_v16 = vshll.u32 %v1271_v15, %v190_v6 }
  0xb7   :  { %v202_v18 = vshll.u32 %v1272_v17, %v190_v6  ;;  %v205_v20 = vshll.u32 %v1273_v19, %v190_v6  ;;  %vm208_vm1 = vcmp.lt.s32.totalorder %v189_v5, 1  ;;  %vm210_vm2 = vcmp.lt.s32.totalorder %v189_v5, 3 }
  0xb8   :  { %v194_v21 = vshrl.u32 %v1270_v13, %v191_v8  ;;  %v197_v22 = vshrl.u32 %v1271_v15, %v191_v8  ;;  %v200_v23 = vshrl.u32 %v1272_v17, %v191_v8  ;;  %v192_v24 = vshrl.u32 %v1269_v9, %v191_v8 }
  0xb9   :  { %v203_v25 = vshrl.u32 %v1273_v19, %v191_v8  ;;  %v206_v27 = vshrl.u32 %v1274_v26, %v191_v8  ;;  %vm291_vm3 = vcmp.gt.s32.totalorder %v290_v12, 0  ;;  %vm211_vm4 = vcmp.lt.s32.totalorder %v189_v5, 4 }
  0xba   :  { %v195_v28 = vor.u32 %v194_v21, %v193_v10  ;;  %v198_v29 = vor.u32 %v197_v22, %v196_v14  ;;  %v201_v30 = vor.u32 %v200_v23, %v199_v16  ;;  %v292_v33 = vsel %vm291_vm3, %v290_v12, 0 }
  0xbb   :  { %v204_v31 = vor.u32 %v203_v25, %v202_v18  ;;  %v207_v32 = vor.u32 %v206_v27, %v205_v20  ;;  %vm209_vm5 = vcmp.lt.s32.totalorder %v189_v5, 2  ;;  %v294_v44 = vand.u32 31, %v292_v33 }
  0xbc   :  { %v212_v34 = vsel %vm208_vm1, %v192_v24, %v195_v28  ;;  %v213_v35 = vsel %vm211_vm4, %v201_v30, 2102212464  ;;  %v216_v36 = vsel %vm208_vm1, %v195_v28, %v198_v29  ;;  %v220_v37 = vsel %vm208_vm1, %v198_v29, %v201_v30 }
  0xbd   :  { %v214_v38 = vsel %vm210_vm2, %v198_v29, %v213_v35  ;;  %v217_v39 = vsel %vm211_vm4, %v204_v31, 920167782  ;;  %v221_v40 = vsel %vm211_vm4, %v207_v32, 1326507024  ;;  %v293_v55 = vshrl.u32 %v292_v33, 5 }
  0xbe   :  { %v218_v42 = vsel %vm210_vm2, %v201_v30, %v217_v39  ;;  %v222_v43 = vsel %vm210_vm2, %v204_v31, %v221_v40  ;;  %v215_v45 = vsel %vm209_vm5, %v212_v34, %v214_v38  ;;  %v295_v56 = vsub.s32 32, %v294_v44  ;;  %v1394_v31 = vpop.permute.xlu0 %83 }
  0xbf   :  { %v219_v46 = vsel %vm209_vm5, %v216_v36, %v218_v42  ;;  %v223_v47 = vsel %vm209_vm5, %v220_v37, %v222_v43  ;;  %v231_v59 = vmul.u32 %v1362_v7, %v215_v45  ;;  %v297_v60 = vshll.u32 %v1269_v9, %v294_v44 }
  0xc0   :  { %v1375_v48 = vmul.u32.u64.low %v1362_v7, %v223_v47  ;;  %v1376_v49 = vmul.u32.u64.high %v1362_v7, %v223_v47, %v1375_v48  ;;  %v1379_v50 = vmul.u32.u64.low %v1362_v7, %v219_v46  ;;  %v1380_v51 = vmul.u32.u64.high %v1362_v7, %v219_v46, %v1379_v50 }
  0xc1   :  { %v300_v61 = vshll.u32 %v1270_v13, %v294_v44  ;;  %v303_v62 = vshll.u32 %v1271_v15, %v294_v44  ;;  %v298_v63 = vshrl.u32 %v1270_v13, %v295_v56  ;;  %v301_v1 = vshrl.u32 %v1271_v15, %v295_v56  ;;  %v1391_v13 = vpop.permute.xlu1 %76 }
  0xc2   :  { %v304_v4 = vshrl.u32 %v1272_v17, %v295_v56  ;;  %v306_v5 = vshll.u32 %v1272_v17, %v294_v44  ;;  %vm233_vm6 = vc.u32 %v1376_v49, %v1379_v50  ;;  %v234_v6 = vadd.s32 1, %v1380_v51  ;;  %v1409_v43 = vpop.permute.xlu0 %97 }
  0xc3   :  { %v307_v8 = vshrl.u32 %v1273_v19, %v295_v56  ;;  %v309_v10 = vshll.u32 %v1273_v19, %v294_v44  ;;  %v299_v11 = vor.u32 %v298_v63, %v297_v60  ;;  %v302_v12 = vor.u32 %v301_v1, %v300_v61 }
  0xc4   :  { %v305_v14 = vor.u32 %v304_v4, %v303_v62  ;;  %v310_v16 = vshrl.u32 %v1274_v26, %v295_v56  ;;  %v235_v7 = vsel %vm233_vm6, %v234_v6, %v1380_v51  ;;  %vm312_vm7 = vcmp.lt.s32.totalorder %v293_v55, 1 }
  0xc5   :  { %v308_v18 = vor.u32 %v307_v8, %v306_v5  ;;  %vm315_vm8 = vcmp.lt.s32.totalorder %v293_v55, 4  ;;  %v236_v15 = vadd.s32 %v235_v7, %v231_v59  ;;  %vm314_vm9 = vcmp.lt.s32.totalorder %v293_v55, 3  ;;  %v1404_v37 = vpop.permute.xlu1 %90 }
  0xc6   :  { %v311_v17 = vor.u32 %v310_v16, %v309_v10  ;;  %v317_v20 = vsel %vm315_vm8, %v305_v14, 2102212464  ;;  %v296_v21 = vshrl.u32 %v1269_v9, %v295_v56  ;;  %v320_v22 = vsel %vm312_vm7, %v299_v11, %v302_v12  ;;  %v1414_v59 = vpop.permute.xlu0 %111 }
  0xc7   :  { %v321_v23 = vsel %vm315_vm8, %v308_v18, 920167782  ;;  %v324_v19 = vsel %vm312_vm7, %v302_v12, %v305_v14  ;;  %v237_v24 = vadd.s32 536870912, %v236_v15  ;;  %vm313_vm10 = vcmp.lt.s32.totalorder %v293_v55, 2 }
  0xc8   :  { %v322_v25 = vsel %vm314_vm9, %v305_v14, %v321_v23  ;;  %v325_v26 = vsel %vm315_vm8, %v311_v17, 1326507024  ;;  %v316_v27 = vsel %vm312_vm7, %v296_v21, %v299_v11  ;;  %v318_v28 = vsel %vm314_vm9, %v302_v12, %v317_v20 }
  0xc9   :  { %v323_v29 = vsel %vm313_vm10, %v320_v22, %v322_v25  ;;  %v326_v30 = vsel %vm314_vm9, %v308_v18, %v325_v26  ;;  %v1396_v32 = vshrl.u32 %v237_v24, 30  ;;  %v319_v39 = vsel %vm313_vm10, %v316_v27, %v318_v28  ;;  %v1412_v47 = vpop.permute.xlu1 %104 }
  0xca   :  { %v327_v33 = vsel %vm313_vm10, %v324_v19, %v326_v30  ;;  %v1398_v34 = vmul.u32.u64.low %v328_v58, %v323_v29  ;;  %v1399_v35 = vmul.u32.u64.high %v328_v58, %v323_v29, %v1398_v34  ;;  %v335_v42 = vmul.u32 %v328_v58, %v319_v39  ;;  %v1420_v8 = vpop.permute.xlu0 %125 }
  0xcb   :  { %v1401_v9 = vmul.u32.u64.low %v328_v58, %v327_v33  ;;  %v1402_v36 = vmul.u32.u64.high %v328_v58, %v327_v33, %v1401_v9  ;;  %v239_v38 = vshll.u32 %v1396_v32, 30  ;;  %v232_v1 = vadd.s32 %v1379_v50, %v1376_v49 }
  0xcc   :  { %v338_v41 = vadd.s32 1, %v1399_v35  ;;  %v262_v19 = vsub.s32 4, %v1396_v32  ;;  %vm281_vm1 = vcmp.le.f32.partialorder %v280_v0, 0.7853982  ;;  %vm268_vm8 = vweird.f32 %v1352_v52 }
  0xcd   :  { %v240_v40 = vsub.s32 %v236_v15, %v239_v38  ;;  %vm337_vm11 = vc.u32 %v1402_v36, %v1398_v34  ;;  %v1416_v62 = vpop.permute.xlu1 %118  ;;  %v336_v25 = vadd.s32 %v1398_v34, %v1402_v36  ;;  %vm580_vm9 = vcmask 130048  }
  0xce   :  { %v339_v45 = vsel %vm337_vm11, %v338_v41, %v1399_v35  ;;  %v1424_v21 = vpop.permute.xlu0 %139  ;;  %v263_v38 = vsel %vm178_vm14, %v262_v19, %v1396_v32  ;;  %vm372_vm11 = vweird.f32 %v1356_v57 }
  0xcf   :  { %v242_v44 = vsub.s32 0, %v240_v40  ;;  %v340_v46 = vadd.s32 %v339_v45, %v335_v42  ;;  %v265_v41 = vsel %vm177_vm15, 0, %v263_v38 }
  0xd0   :  { %v269_v53 = vadd.s32 3, %v265_v41 }
  0xd1   :  { %v1147_v48 = vmin.u32 %v242_v44, %v240_v40  ;;  %v341_v51 = vadd.s32 536870912, %v340_v46  ;;  %v1422_v16 = vpop.permute.xlu1 %132 }
  0xd2   :  { %v1431_v35 = vpop.permute.xlu0 %153 }
  0xd3   :  { %v244_v55 = vclz %v1147_v48  ;;  %v342_v56 = vshrl.u32 %v341_v51, 30  ;;  %v1275_v48 = vmov 1966171168  }
  0xd4   :  { %v388_v51 = vunpack.c.l.s4 %v1275_v48 }
  0xd5   :  { %v1148_v60 = vadd.s32 4294967294, %v244_v55  ;;  %v343_v61 = vshll.u32 %v342_v56, 30  ;;  %v1426_v50 = vpop.permute.xlu1 %146  ;;  %v366_v44 = vsub.s32 4, %v342_v56 }
  0xd6   :  { %v1439_v55 = vpop.permute.xlu0 %167 }
  0xd7   :  { %vm1149_vm12 = vcmp.lt.s32.totalorder %v1148_v60, 0  ;;  %v344_v63 = vsub.s32 %v340_v46, %v343_v61 }
  0xd8   :  { %v247_v58 = vsel %vm1149_vm12, 0, %v1148_v60  ;;  %v367_v60 = vsel %vm282_vm0, %v366_v44, %v342_v56 }
  0xd9   :  { %v248_v4 = vsub.s32 32, %v247_v58  ;;  %v252_v5 = vsub.s32 4294967266, %v247_v58  ;;  %v346_v6 = vsub.s32 0, %v344_v63  ;;  %v249_v10 = vshll.u32 %v240_v40, %v247_v58  ;;  %v1437_v36 = vpop.permute.xlu1 %160 }
  0xdb   :  { %v250_v11 = vshrl.u32 %v232_v1, %v248_v4  ;;  %v253_v12 = vadd.s32 127, %v252_v5  ;;  %v1151_v14 = vmin.u32 %v346_v6, %v344_v63  ;;  %v369_v1 = vsel %vm281_vm1, 0, %v367_v60 }
  0xdc   :  { %v270_v4 = vand.u32 3, %v269_v53  ;;  %v802_v5 = vand.u32 3, %v265_v41 }
  0xdd   :  { %v251_v7 = vor.u32 %v250_v11, %v249_v10  ;;  %v254_v18 = vshll.u32 %v253_v12, 23  ;;  %v348_v15 = vclz %v1151_v14  ;;  %v1442_v61 = vpop.permute.xlu1 %174  ;;  %v1446_v10 = vpop.permute.xlu0 %602 }
  0xde   :  { %vm275_vm2 = vcmp.eq.s32.totalorder %v270_v4, 2  ;;  %vm807_vm3 = vcmp.eq.s32.totalorder %v802_v5, 2  ;;  %vm272_vm4 = vcmp.eq.s32.totalorder %v270_v4, 0  ;;  %vm804_vm5 = vcmp.eq.s32.totalorder %v802_v5, 0 }
  0xdf   :  { %v255_v17 = vor.u32 4788187, %v254_v18  ;;  %v1152_v20 = vadd.s32 4294967294, %v348_v15  ;;  %v258_v49 = vcvt.s32.f32 %v251_v7  ;;  %v373_v18 = vadd.s32 3, %v369_v1 }
  0xe0   :  { %vm271_vm6 = vcmp.lt.s32.totalorder %v270_v4, 2  ;;  %vm803_vm7 = vcmp.lt.s32.totalorder %v802_v5, 2 }
  0xe1   :  { %v256_v22 = vand.u32 2147483647, %v255_v17  ;;  %vm1153_vm13 = vcmp.lt.s32.totalorder %v1152_v20, 0  ;;  %v1452_v15 = vpop.permute.xlu1 %609 }
  0xe2   :  { %v351_v24 = vsel %vm1153_vm13, 0, %v1152_v20 }
  0xe3   :  { %v259_v23 = vmul.f32 %v258_v49, %v256_v22  ;;  %v352_v26 = vsub.s32 32, %v351_v24  ;;  %v356_v27 = vsub.s32 4294967266, %v351_v24  ;;  %v353_v29 = vshll.u32 %v344_v63, %v351_v24  ;;  %v1457_v24 = vpop.permute.xlu0 %616 }
  0xe4   :  { %v389_v63 = vunpack.c.0.s8 %v388_v51 }
  0xe5   :  { %v260_v28 = vxor.u32 2147483648, %v259_v23  ;;  %v354_v30 = vshrl.u32 %v336_v25, %v352_v26  ;;  %v357_v33 = vadd.s32 127, %v356_v27 }
  0xe6   :  { %v1450_v56 = vsub.s32 %v389_v63, %v1323_v2 }
  0xe7   :  { %v261_v9 = vsel %vm178_vm14, %v260_v28, %v259_v23  ;;  %v355_v40 = vor.u32 %v354_v30, %v353_v29  ;;  %v358_v34 = vshll.u32 %v357_v33, 23  ;;  %v1455_v23 = vand.u32 3, %v373_v18  ;;  %v1461_v30 = vpop.permute.xlu1 %623  ;;  %v1482_v51 = vpop.permute.xlu0 %630 }
  0xe8   :  { %v264_v39 = vsel %vm177_vm15, %v1352_v52, %v261_v9  ;;  %v1463_v9 = vand.u32 3, %v369_v1 }
  0xe9   :  { %1184 = vcosq.f32 %v264_v39  ;;  %v359_v42 = vor.u32 4788187, %v358_v34  ;;  %v362_v46 = vcvt.s32.f32 %v355_v40  ;;  %vm375_vm10 = vcmp.lt.s32.totalorder %v1455_v23, 2 }
  0xea   :  { %1186 = vsinq.f32 %v264_v39  ;;  %vm376_vm12 = vcmp.eq.s32.totalorder %v1455_v23, 0  ;;  %vm379_vm13 = vcmp.eq.s32.totalorder %v1455_v23, 2  ;;  %vm907_vm14 = vcmp.eq.s32.totalorder %v1463_v9, 0 }
  0xeb   :  { %v360_v45 = vand.u32 2147483647, %v359_v42  ;;  %vm910_vm15 = vcmp.eq.s32.totalorder %v1463_v9, 2 }
  0xed   :  { %v363_v32 = vmul.f32 %v362_v46, %v360_v45 }
  0xef   :  { %v364_v58 = vxor.u32 2147483648, %v363_v32 }
  0xf1   :  { %v365_v6 = vsel %vm282_vm0, %v364_v58, %v363_v32  ;;  %vm906_vm0 = vcmp.lt.s32.totalorder %v1463_v9, 2 }
  0xf2   :  { %v368_v12 = vsel %vm281_vm1, %v1356_v57, %v365_v6 }
  0xf3   :  { %v1185_v11 = vpop.eup %1184  ;;  %1188 = vcosq.f32 %v368_v12 }
  0xf4   :  { %v1187_v14 = vpop.eup %1186  ;;  %v276_v7 = vxor.u32 2147483648, %v1185_v11  ;;  %1190 = vsinq.f32 %v368_v12 }
  0xf5   :  { %v273_v0 = vxor.u32 2147483648, %v1187_v14 }
  0xf6   :  { %v277_v17 = vsel %vm275_vm2, %v276_v7, %v1187_v14  ;;  %v809_v20 = vsel %vm807_vm3, %v276_v7, %v1187_v14 }
  0xf7   :  { %v274_v22 = vsel %vm272_vm4, %v1185_v11, %v273_v0  ;;  %v806_v49 = vsel %vm804_vm5, %v1185_v11, %v273_v0  ;;  %v1494_v11 = vpop.permute.xlu1 %637 }
  0xf8   :  { %v278_v2 = vsel %vm271_vm6, %v274_v22, %v277_v17  ;;  %v810_v19 = vsel %vm803_vm7, %v806_v49, %v809_v20 }
  0xf9   :  { %v279_v25 = vsel %vm268_vm8, nan, %v278_v2  ;;  %v811_v26 = vsel %vm268_vm8, nan, %v810_v19 }
  0xfa   :  { %v393_v27 = vrot.slane %v279_v25, %v1450_v56  ;;  %v386_v28 = vcombine.high %v279_v25, %v279_v25  ;;  %v924_v29 = vrot.slane %v811_v26, %v1450_v56  ;;  %v917_v33 = vcombine.high %v811_v26, %v811_v26 }
  0xfc   :  { %v409_v52 = vrot.slane %v393_v27, %v1450_v56  ;;  %v401_v38 = vcombine.high %v393_v27, %v393_v27  ;;  %v400_v39 = vrot.slane %v386_v28, %v1450_v56  ;;  %v1469_v40 = vrot.slane %v924_v29, %v1450_v56 }
  0xfd   :  { %v932_v34 = vcombine.high %v924_v29, %v924_v29  ;;  %v1475_v41 = vrot.slane %v917_v33, %v1450_v56  ;;  %v1477_v42 = vpop.eup %1188 }
  0xfe   :  { %v487_v44 = vrot.slane %v409_v52, %v1326_v3  ;;  %v423_v45 = vrot.slane %v401_v38, %v1450_v56  ;;  %v431_v46 = vcombine.high %v409_v52, %v409_v52  ;;  %v416_v48 = vrot.slane %v400_v39, %v1450_v56  ;;  %v1484_v53 = vpop.eup %1190  ;;  %v1532_v38 = vpop.permute.xlu1 %651 }
  0xff   :  { %v402_v32 = vcombine.high %v400_v39, %v400_v39  ;;  %v380_v60 = vxor.u32 2147483648, %v1477_v42  ;;  %v1018_v58 = vrot.slane %v1469_v40, %v1326_v3  ;;  %v954_v63 = vrot.slane %v932_v34, %v1450_v56 }
 0x100   :  { %v564_v1 = vadd.f32 %v487_v44, %v1383_v54  ;;  %v491_v4 = vrot.slane %v423_v45, %v1326_v3  ;;  %v495_v5 = vrot.slane %v431_v46, %v1326_v3  ;;  %v433_v6 = vcombine.high %v423_v45, %v423_v45 }
 0x101   :  { %v503_v12 = vrot.slane %v416_v48, %v1326_v3  ;;  %v430_v14 = vrot.slane %v402_v32, %v1450_v56  ;;  %v432_v7 = vcombine.high %v416_v48, %v416_v48  ;;  %v377_v18 = vxor.u32 2147483648, %v1484_v53 }
 0x102   :  { %581 = vst.msk [vmem:[#allocation7] sm:$0xff] %vm580_vm9, %v564_v1  ;;  %v565_v0 = vadd.f32 %v491_v4, %v1391_v13  ;;  %v566_v54 = vadd.f32 %v495_v5, %v1394_v31  ;;  %v499_v17 = vrot.slane %v433_v6, %v1326_v3  ;;  %v381_v20 = vsel %vm379_vm13, %v380_v60, %v1484_v53 }
 0x103   :  { %v568_v22 = vadd.f32 %v503_v12, %v1409_v43  ;;  %v507_v49 = vrot.slane %v430_v14, %v1326_v3  ;;  %v511_v2 = vrot.slane %v432_v7, %v1326_v3  ;;  %v434_v19 = vcombine.high %v430_v14, %v430_v14  ;;  %v645_v43 = vpop.permute.xlu0 %644 }
 0x104   :  { %582 = vst.msk [vmem:[#allocation7 + $0x8] sm:$0xff] %vm580_vm9, %v565_v0  ;;  %583 = vst.msk [vmem:[#allocation7 + $0x10] sm:$0xff] %vm580_vm9, %v566_v54  ;;  %v567_v13 = vadd.f32 %v499_v17, %v1404_v37  ;;  %v378_v31 = vsel %vm376_vm12, %v1477_v42, %v377_v18  ;;  %v1095_v25 = vadd.f32 %v1018_v58, %v1446_v10  ;;  %v1566_v0 = vpop.permute.xlu1 %665 }
 0x105   :  { %v1022_v26 = vrot.slane %v954_v63, %v1326_v3  ;;  %585 = vst.msk [vmem:[#allocation7 + $0x20] sm:$0xff] %vm580_vm9, %v568_v22  ;;  %v569_v27 = vadd.f32 %v507_v49, %v1412_v47  ;;  %v570_v28 = vadd.f32 %v511_v2, %v1414_v59  ;;  %v515_v29 = vrot.slane %v434_v19, %v1326_v3 }
 0x106   :  { %v382_v37 = vsel %vm375_vm10, %v378_v31, %v381_v20  ;;  %584 = vst.msk [vmem:[#allocation7 + $0x18] sm:$0xff] %vm580_vm9, %v567_v13  ;;  %1112 = vst.msk [vmem:[#allocation7 + $0x80] sm:$0xff] %vm580_vm9, %v1095_v25  ;;  %v962_v52 = vcombine.high %v1469_v40, %v1469_v40  ;;  %v964_v47 = vcombine.high %v954_v63, %v954_v63 }
 0x107   :  { %v383_v33 = vsel %vm372_vm11, nan, %v382_v37  ;;  %v1096_v10 = vadd.f32 %v1022_v26, %v1452_v15  ;;  %586 = vst.msk [vmem:[#allocation7 + $0x28] sm:$0xff] %vm580_vm9, %v569_v27  ;;  %587 = vst.msk [vmem:[#allocation7 + $0x30] sm:$0xff] %vm580_vm9, %v570_v28  ;;  %v571_v59 = vadd.f32 %v515_v29, %v1416_v62  ;;  %v947_v34 = vrot.slane %v1475_v41, %v1450_v56  ;;  %v1556_v4 = vpop.permute.xlu0 %658 }
 0x108   :  { %v442_v23 = vrot.slane %v383_v33, %v1450_v56  ;;  %v435_v39 = vcombine.high %v383_v33, %v383_v33  ;;  %v1026_v15 = vrot.slane %v962_v52, %v1326_v3  ;;  %v1030_v40 = vrot.slane %v964_v47, %v1326_v3 }
 0x109   :  { %1113 = vst.msk [vmem:[#allocation7 + $0x88] sm:$0xff] %vm580_vm9, %v1096_v10  ;;  %v933_v44 = vcombine.high %v1475_v41, %v1475_v41  ;;  %v909_v45 = vsel %vm907_vm14, %v1477_v42, %v377_v18  ;;  %588 = vst.msk [vmem:[#allocation7 + $0x38] sm:$0xff] %vm580_vm9, %v571_v59  ;;  %v1034_v32 = vrot.slane %v947_v34, %v1326_v3  ;;  %v680_v10 = vpop.permute.xlu1 %679 }
 0x10a   :  { %v458_v62 = vrot.slane %v442_v23, %v1450_v56  ;;  %v450_v46 = vcombine.high %v442_v23, %v442_v23  ;;  %v449_v48 = vrot.slane %v435_v39, %v1450_v56  ;;  %v1097_v58 = vadd.f32 %v1026_v15, %v1457_v24 }
 0x10b   :  { %v1098_v63 = vadd.f32 %v1030_v40, %v1461_v30  ;;  %v961_v41 = vrot.slane %v933_v44, %v1450_v56  ;;  %v963_v1 = vcombine.high %v947_v34, %v947_v34  ;;  %v1099_v24 = vadd.f32 %v1034_v32, %v1482_v51  ;;  %v673_v37 = vpop.permute.xlu0 %672 }
 0x10c   :  { %v519_v5 = vrot.slane %v458_v62, %v1326_v3  ;;  %v472_v6 = vrot.slane %v450_v46, %v1450_v56  ;;  %v480_v12 = vcombine.high %v458_v62, %v458_v62  ;;  %v465_v14 = vrot.slane %v449_v48, %v1450_v56  ;;  %1114 = vst.msk [vmem:[#allocation7 + $0x90] sm:$0xff] %vm580_vm9, %v1097_v58 }
 0x10d   :  { %v451_v7 = vcombine.high %v449_v48, %v449_v48  ;;  %1115 = vst.msk [vmem:[#allocation7 + $0x98] sm:$0xff] %vm580_vm9, %v1098_v63  ;;  %v1038_v30 = vrot.slane %v961_v41, %v1326_v3  ;;  %v1042_v18 = vrot.slane %v963_v1, %v1326_v3  ;;  %1116 = vst.msk [vmem:[#allocation7 + $0xa0] sm:$0xff] %vm580_vm9, %v1099_v24  ;;  %v694_v15 = vpop.permute.xlu1 %693 }
 0x10e   :  { %v572_v54 = vadd.f32 %v519_v5, %v1420_v8  ;;  %v523_v17 = vrot.slane %v472_v6, %v1326_v3  ;;  %v527_v20 = vrot.slane %v480_v12, %v1326_v3  ;;  %v482_v22 = vcombine.high %v472_v6, %v472_v6 }
 0x10f   :  { %v535_v49 = vrot.slane %v465_v14, %v1326_v3  ;;  %v479_v2 = vrot.slane %v451_v7, %v1450_v56  ;;  %v481_v19 = vcombine.high %v465_v14, %v465_v14  ;;  %v1100_v51 = vadd.f32 %v1038_v30, %v1494_v11  ;;  %v687_v57 = vpop.permute.xlu0 %686 }
 0x110   :  { %589 = vst.msk [vmem:[#allocation7 + $0x40] sm:$0xff] %vm580_vm9, %v572_v54  ;;  %v573_v13 = vadd.f32 %v523_v17, %v1422_v16  ;;  %v574_v8 = vadd.f32 %v527_v20, %v1424_v21  ;;  %v531_v31 = vrot.slane %v482_v22, %v1326_v3  ;;  %v1101_v25 = vadd.f32 %v1042_v18, %v645_v43 }
 0x111   :  { %v576_v26 = vadd.f32 %v535_v49, %v1431_v35  ;;  %v539_v27 = vrot.slane %v479_v2, %v1326_v3  ;;  %v543_v28 = vrot.slane %v481_v19, %v1326_v3  ;;  %v483_v29 = vcombine.high %v479_v2, %v479_v2  ;;  %1117 = vst.msk [vmem:[#allocation7 + $0xa8] sm:$0xff] %vm580_vm9, %v1100_v51  ;;  %v708_v14 = vpop.permute.xlu1 %707 }
 0x112   :  { %590 = vst.msk [vmem:[#allocation7 + $0x48] sm:$0xff] %vm580_vm9, %v573_v13  ;;  %591 = vst.msk [vmem:[#allocation7 + $0x50] sm:$0xff] %vm580_vm9, %v574_v8  ;;  %v575_v16 = vadd.f32 %v531_v31, %v1426_v50  ;;  %v965_v21 = vcombine.high %v961_v41, %v961_v41  ;;  %v912_v35 = vsel %vm910_vm15, %v380_v60, %v1484_v53 }
 0x113   :  { %1118 = vst.msk [vmem:[#allocation7 + $0xb0] sm:$0xff] %vm580_vm9, %v1101_v25  ;;  %593 = vst.msk [vmem:[#allocation7 + $0x60] sm:$0xff] %vm580_vm9, %v576_v26  ;;  %v577_v11 = vadd.f32 %v539_v27, %v1437_v36  ;;  %v578_v43 = vadd.f32 %v543_v28, %v1439_v55  ;;  %v547_v33 = vrot.slane %v483_v29, %v1326_v3  ;;  %v701_v1 = vpop.permute.xlu0 %700 }
 0x114   :  { %v913_v50 = vsel %vm906_vm0, %v909_v45, %v912_v35  ;;  %592 = vst.msk [vmem:[#allocation7 + $0x58] sm:$0xff] %vm580_vm9, %v575_v16  ;;  %v1046_v52 = vrot.slane %v965_v21, %v1326_v3 }
 0x115   :  { %v914_v42 = vsel %vm372_vm11, nan, %v913_v50  ;;  %594 = vst.msk [vmem:[#allocation7 + $0x68] sm:$0xff] %vm580_vm9, %v577_v11  ;;  %595 = vst.msk [vmem:[#allocation7 + $0x70] sm:$0xff] %vm580_vm9, %v578_v43  ;;  %v579_v9 = vadd.f32 %v547_v33, %v1442_v61 }
 0x116   :  { %v973_v36 = vrot.slane %v914_v42, %v1450_v56  ;;  %v966_v55 = vcombine.high %v914_v42, %v914_v42  ;;  %v1102_v53 = vadd.f32 %v1046_v52, %v1532_v38 }
 0x117   :  { %596 = vst.msk [vmem:[#allocation7 + $0x78] sm:$0xff] %vm580_vm9, %v579_v9 }
 0x118   :  { %v989_v60 = vrot.slane %v973_v36, %v1450_v56  ;;  %v981_v47 = vcombine.high %v973_v36, %v973_v36  ;;  %v980_v59 = vrot.slane %v966_v55, %v1450_v56  ;;  %1119 = vst.msk [vmem:[#allocation7 + $0xb8] sm:$0xff] %vm580_vm9, %v1102_v53 }
 0x11a   :  { %v1050_v23 = vrot.slane %v989_v60, %v1326_v3  ;;  %v1003_v39 = vrot.slane %v981_v47, %v1450_v56  ;;  %v1011_v61 = vcombine.high %v989_v60, %v989_v60  ;;  %v996_v34 = vrot.slane %v980_v59, %v1450_v56 }
 0x11b   :  { %v982_v40 = vcombine.high %v980_v59, %v980_v59 }
 0x11c   :  { %v1103_v38 = vadd.f32 %v1050_v23, %v1556_v4  ;;  %v1054_v44 = vrot.slane %v1003_v39, %v1326_v3  ;;  %v1058_v45 = vrot.slane %v1011_v61, %v1326_v3  ;;  %v1013_v62 = vcombine.high %v1003_v39, %v1003_v39 }
 0x11d   :  { %v1066_v46 = vrot.slane %v996_v34, %v1326_v3  ;;  %v1010_v48 = vrot.slane %v982_v40, %v1450_v56  ;;  %v1012_v32 = vcombine.high %v996_v34, %v996_v34 }
 0x11e   :  { %1120 = vst.msk [vmem:[#allocation7 + $0xc0] sm:$0xff] %vm580_vm9, %v1103_v38  ;;  %v1104_v58 = vadd.f32 %v1054_v44, %v1566_v0  ;;  %v1105_v63 = vadd.f32 %v1058_v45, %v673_v37  ;;  %v1062_v41 = vrot.slane %v1013_v62, %v1326_v3 }
 0x11f   :  { %v1107_v5 = vadd.f32 %v1066_v46, %v687_v57  ;;  %v1070_v4 = vrot.slane %v1010_v48, %v1326_v3  ;;  %v1074_v6 = vrot.slane %v1012_v32, %v1326_v3  ;;  %v1014_v12 = vcombine.high %v1010_v48, %v1010_v48 }
 0x120   :  { %1121 = vst.msk [vmem:[#allocation7 + $0xc8] sm:$0xff] %vm580_vm9, %v1104_v58  ;;  %1122 = vst.msk [vmem:[#allocation7 + $0xd0] sm:$0xff] %vm580_vm9, %v1105_v63  ;;  %v1106_v56 = vadd.f32 %v1062_v41, %v680_v10 }
 0x121   :  { %1124 = vst.msk [vmem:[#allocation7 + $0xe0] sm:$0xff] %vm580_vm9, %v1107_v5  ;;  %v1108_v7 = vadd.f32 %v1070_v4, %v694_v15  ;;  %v1109_v24 = vadd.f32 %v1074_v6, %v701_v1  ;;  %v1078_v30 = vrot.slane %v1014_v12, %v1326_v3 }
 0x122   :  { %1123 = vst.msk [vmem:[#allocation7 + $0xd8] sm:$0xff] %vm580_vm9, %v1106_v56 }
 0x123   :  { %1125 = vst.msk [vmem:[#allocation7 + $0xe8] sm:$0xff] %vm580_vm9, %v1108_v7  ;;  %1126 = vst.msk [vmem:[#allocation7 + $0xf0] sm:$0xff] %vm580_vm9, %v1109_v24  ;;  %v1110_v18 = vadd.f32 %v1078_v30, %v708_v14 }
 0x125   :  { %1127 = vst.msk [vmem:[#allocation7 + $0xf8] sm:$0xff] %vm580_vm9, %v1110_v18 }
 0x126   :  { %1247 = shalt.err (!%p1244_p6)
}
 0x127   :  { %s1248_s10 = scalar_lea.hbm %s1648_s2, 4096 }
 0x128   :  { %p1249_p7 = scmp.ne.s32.totalorder %s1648_s2, %s1248_s10  ;;  %p1252_p8 = scmp.lt.u32.totalorder %s1248_s10, %s1648_s2 }
 0x12a   :  { %p1254_p9 = pnand %p1252_p8, %p1249_p7 }
 0x12c   :  { %1257 = shalt.err (!%p1254_p9)
}
 0x12d   :  { %1139 = dma.vmem_to_hbm [thread:$0]  %s1134_s6, 4096, %s1648_s2, [#allocation4], %s1265_s19, %s1265_s19, %s1266_s20  }
 0x12e   :  { %1262 = dma.done.wait [#allocation4], 4096  }
 0x12f   :  { %1263 = vsyncadd [#allocation4], 4294963200 }
 0x130   :  { %1143 = vsyncpa [#allocation3], 1 }
 0x131   :  { %1144 = vsyncpa [#allocation6], 1 }
 0x132   :  { %1145 = vsyncpa [#allocation4], 1 }

</bundles_post_ra>
